<compile_context>
chip_gen: v7x
topology: tpu7x:2x2x1
jax: 0.10.0
libtpu: 0.0.40
codegen_flags: <defaults>
</compile_context>

<pallas_src>
import functools

import jax
import jax.numpy as jnp
from jax import lax
from jax.experimental import pallas as pl
from jax.experimental.pallas import tpu as pltpu


# ----------------------------- Pallas kernel --------------------------------

def _conv_bn_kernel(x_ref, w_ref, shift_ref, o_ref):
    # x_ref:     (in_chs, ts)     spatial tile of one image (channels on
    #                             sublanes, spatial on lanes -> lane-dense).
    # w_ref:     (out_chs, in_chs) 1x1-conv weight with BN scale folded in.
    # shift_ref: (out_chs, 1)     folded BN shift (f32).
    # o_ref:     (out_chs, ts)    written in out_dtype (bf16 by default).
    y = jnp.dot(w_ref[...], x_ref[...], preferred_element_type=jnp.float32)
    o_ref[...] = (y + shift_ref[...]).astype(o_ref.dtype)


# ------------------------------ helpers --------------------------------------

def _generation_defaults():
    """Best-effort per-generation defaults; conservative fallback if unknown."""
    kind = ""
    try:
        kind = jax.devices()[0].device_kind.lower()
    except Exception:  # pragma: no cover - detection is best-effort only
        pass
    if "v7" in kind:
        # 64 MiB physical VMEM, 2 TensorCores, ~3.2 TB/s HBM per TC.
        return dict(num_cores=2, vmem_budget=24 << 20, vmem_limit=32 << 20,
                    tile_target=8192)
    if "v6" in kind or "v5" in kind:
        # 128 MiB VMEM, 1 TensorCore: don't split N==1, don't clamp the tile.
        return dict(num_cores=1, vmem_budget=48 << 20, vmem_limit=64 << 20,
                    tile_target=2048)
    # Unknown generation: budgets that fit every chip's physical VMEM.
    return dict(num_cores=2, vmem_budget=16 << 20, vmem_limit=32 << 20,
                tile_target=4096)


def _avg_pool_2x2_ceil(x, out_dtype):
    """AvgPool2d((2,2), stride=2, ceil_mode=True, count_include_pad=False), NCHW.

    Single fused XLA pass producing a 1/4-size `out_dtype` intermediate.
    """
    N, C, H, W = x.shape
    Hp, Wp = -(-H // 2), -(-W // 2)
    if H % 2 == 0 and W % 2 == 0:
        # Even fast path: no pad, constant 1/4 divisor, one fused pool+cast.
        win_sum = x.reshape(N, C, Hp, 2, Wp, 2).sum(axis=(3, 5))
        return (win_sum * jnp.asarray(0.25, x.dtype)).astype(out_dtype)
    xpad = jnp.pad(x, ((0, 0), (0, 0), (0, 2 * Hp - H), (0, 2 * Wp - W)))
    win_sum = xpad.reshape(N, C, Hp, 2, Wp, 2).sum(axis=(3, 5))
    rows = jnp.minimum(H - 2 * jnp.arange(Hp), 2).astype(x.dtype)  # valid rows/window
    cols = jnp.minimum(W - 2 * jnp.arange(Wp), 2).astype(x.dtype)  # valid cols/window
    return (win_sum / (rows[:, None] * cols[None, :])).astype(out_dtype)


def _choose_spatial_tile(S, bytes_per_col, N, *, target, budget, num_cores):
    """Spatial (lane) tile: big enough to amortize ~0.35us per-step pipeline
    overhead, small enough for the VMEM budget, lane-aligned, and (only on
    2-TC chips) split for N==1 so both cores get work."""
    if S <= 256:
        return S                        # single full block (full-dim minor is legal)
    cap = max(128, budget // max(1, bytes_per_col))
    ts = min(S, target, cap)
    ts = max(128, (ts // 128) * 128)    # lane-aligned
    if num_cores >= 2 and N == 1 and ts >= S:
        ts = max(128, ((S // 2) // 128) * 128)   # keep >=2 grid steps for 2 TCs
    return ts


def init_patch_embed_params(key, in_chs, out_chs):
    k1, k2, k3, k4, k5 = jax.random.split(key, 5)
    return {
        # nn.Conv2d(in_chs, out_chs, kernel_size=1, bias=False) -> (O, I, 1, 1)
        "conv_weight": 0.1 * jax.random.normal(k1, (out_chs, in_chs, 1, 1), jnp.float32),
        # nn.BatchNorm2d(out_chs), eval-mode running stats.
        "bn_weight": 1.0 + 0.1 * jax.random.normal(k2, (out_chs,), jnp.float32),
        "bn_bias": 0.1 * jax.random.normal(k3, (out_chs,), jnp.float32),
        "bn_running_mean": 0.1 * jax.random.normal(k4, (out_chs,), jnp.float32),
        "bn_running_var": 1.0 + 0.1 * jnp.abs(jax.random.normal(k5, (out_chs,), jnp.float32)),
    }


# ------------------------------ Python wrapper -------------------------------

def patch_embed_forward(
    x, params, *, stride, in_chs, out_chs, eps=1e-5,
    compute_dtype=jnp.bfloat16,   # bf16 streaming on all generations (f32 MXU acc)
    out_dtype=None,               # default: compute_dtype (bf16 output writeback)
    weight_dtype=None,            # default: compute_dtype; set f32 for bit-closeness
    spatial_tile=None,            # default: per-generation target (2048 / 8192)
    vmem_budget_bytes=None,       # default: per-generation streaming-block budget
    vmem_limit_bytes=None,        # default: per-generation scoped VMEM limit
    num_cores=None,               # default: per-generation TensorCore count
    input_buffers=2,              # >2 => pl.Buffered(n) on the streaming input
):
    """Pallas implementation of PatchEmbed.forward.  x: (N, C_in, H, W) NCHW."""
    if stride != 2 and in_chs == out_chs:
        return x                        # Identity / Identity / Identity branch

    N, C, H, W = x.shape
    assert C == in_chs

    d = _generation_defaults()
    out_dtype = compute_dtype if out_dtype is None else out_dtype
    weight_dtype = compute_dtype if weight_dtype is None else weight_dtype
    spatial_tile = d["tile_target"] if spatial_tile is None else spatial_tile
    vmem_budget_bytes = d["vmem_budget"] if vmem_budget_bytes is None else vmem_budget_bytes
    vmem_limit_bytes = d["vmem_limit"] if vmem_limit_bytes is None else vmem_limit_bytes
    num_cores = d["num_cores"] if num_cores is None else num_cores

    # Fold eval-mode BatchNorm2d (running stats) into the 1x1-conv weight.
    w_oc = params["conv_weight"][:, :, 0, 0].astype(jnp.float32)             # (O, C)
    scale = params["bn_weight"] / jnp.sqrt(params["bn_running_var"] + eps)   # (O,)
    shift = params["bn_bias"] - params["bn_running_mean"] * scale            # (O,)
    w_eff = (w_oc * scale[:, None]).astype(weight_dtype)                     # (O, C)
    shift = shift.reshape(out_chs, 1).astype(jnp.float32)

    if stride == 2:
        xp = _avg_pool_2x2_ceil(x, compute_dtype)    # fused pool+cast, 1/4-size bf16
        Hp, Wp = xp.shape[2], xp.shape[3]
        xf = xp.reshape(N, C, Hp * Wp)               # free reshape
    else:
        # Matches timm: any stride != 2 with in_chs != out_chs -> conv + norm only.
        Hp, Wp = H, W
        xf = x.reshape(N, C, H * W).astype(compute_dtype)

    S = Hp * Wp

    in_item = jnp.dtype(compute_dtype).itemsize
    out_item = jnp.dtype(out_dtype).itemsize
    # input_buffers-deep pipelining on x, double-buffered output, real itemsizes.
    bytes_per_col = input_buffers * C * in_item + 2 * out_chs * out_item
    ts = _choose_spatial_tile(S, bytes_per_col, N, target=spatial_tile,
                              budget=vmem_budget_bytes, num_cores=num_cores)

    x_spec_kwargs = {}
    if input_buffers > 2:                            # deeper pipelining (v7x) if DMA exposed
        x_spec_kwargs["pipeline_mode"] = pl.Buffered(input_buffers)
    x_spec = pl.BlockSpec((None, C, ts), lambda n, s: (n, 0, s), **x_spec_kwargs)

    out = pl.pallas_call(
        _conv_bn_kernel,
        out_shape=jax.ShapeDtypeStruct((N, out_chs, S), out_dtype),
        grid=(N, pl.cdiv(S, ts)),                    # masked boundary blocks, no asserts
        in_specs=[
            x_spec,
            pl.BlockSpec((out_chs, C), lambda n, s: (0, 0)),  # resident folded weight
            pl.BlockSpec((out_chs, 1), lambda n, s: (0, 0)),  # resident folded shift
        ],
        out_specs=pl.BlockSpec((None, out_chs, ts), lambda n, s: (n, 0, s)),
        compiler_params=pltpu.CompilerParams(
            dimension_semantics=("parallel", "parallel"),
            vmem_limit_bytes=vmem_limit_bytes,
        ),
    )(xf, w_eff, shift)

    return out.reshape(N, out_chs, Hp, Wp)           # free reshape, still NCHW


# ------------------------------ reference (JAX) -------------------------------

def _reference_avg_pool_2x2_ceil(x):
    N, C, H, W = x.shape
    Hp, Wp = -(-H // 2), -(-W // 2)
    pad = ((0, 0), (0, 0), (0, 2 * Hp - H), (0, 2 * Wp - W))
    win = (1, 1, 2, 2)
    ssum = lax.reduce_window(x, 0.0, lax.add, win, win, pad)
    cnt = lax.reduce_window(jnp.ones_like(x), 0.0, lax.add, win, win, pad)
    return ssum / cnt


def _reference_forward(x, params, *, stride, in_chs, out_chs, eps=1e-5):
    if stride != 2 and in_chs == out_chs:
        return x
    if stride == 2:
        x = _reference_avg_pool_2x2_ceil(x)
    y = jnp.einsum("nchw,oc->nohw", x, params["conv_weight"][:, :, 0, 0])
    scale = params["bn_weight"] / jnp.sqrt(params["bn_running_var"] + eps)
    shift = params["bn_bias"] - params["bn_running_mean"] * scale
    return y * scale[None, :, None, None] + shift[None, :, None, None]


# ----------------------------------- main -------------------------------------

if __name__ == "__main__":
    key = jax.random.PRNGKey(0)
    kx, kxo, kp, kp2 = jax.random.split(key, 4)

    in_chs, out_chs = 4, 32
    params = init_patch_embed_params(kp, in_chs, out_chs)

    # 1) stride-2 branch (pool + conv + BN), even spatial dims, bf16 defaults, jit.
    x = jax.random.normal(kx, (2, in_chs, 16, 16), jnp.float32)   # NCHW like PyTorch
    fwd = jax.jit(functools.partial(patch_embed_forward, stride=2,
                                    in_chs=in_chs, out_chs=out_chs))
    y = jax.block_until_ready(fwd(x, params))
    y_ref = _reference_forward(x, params, stride=2, in_chs=in_chs, out_chs=out_chs)
    assert y.shape == (2, out_chs, 8, 8), y.shape
    assert y.dtype == jnp.bfloat16, y.dtype
    assert jnp.allclose(y.astype(jnp.float32), y_ref, atol=5e-2, rtol=5e-2), "stride-2 mismatch"

    # 2) f32 precision path: exact check of pool / BN-fold / tiling logic.
    y_f32 = jax.block_until_ready(
        patch_embed_forward(x, params, stride=2, in_chs=in_chs, out_chs=out_chs,
                            compute_dtype=jnp.float32, out_dtype=jnp.float32))
    assert jnp.allclose(y_f32, y_ref, atol=1e-5, rtol=1e-5), "f32 mismatch"

    # 3) odd spatial dims: ceil_mode=True / count_include_pad=False edge windows.
    x_odd = jax.random.normal(kxo, (2, in_chs, 15, 15), jnp.float32)
    y2 = jax.block_until_ready(
        patch_embed_forward(x_odd, params, stride=2, in_chs=in_chs, out_chs=out_chs,
                            compute_dtype=jnp.float32, out_dtype=jnp.float32))
    y2_ref = _reference_forward(x_odd, params, stride=2, in_chs=in_chs, out_chs=out_chs)
    assert y2.shape == (2, out_chs, 8, 8), y2.shape
    assert jnp.allclose(y2, y2_ref, atol=1e-5, rtol=1e-5), "odd-shape mismatch"

    # 4) stride-1, in_chs != out_chs branch (Identity pool, conv + BN), bf16 defaults.
    params3 = init_patch_embed_params(kp2, in_chs, out_chs)
    y3 = jax.block_until_ready(
        patch_embed_forward(x, params3, stride=1, in_chs=in_chs, out_chs=out_chs))
    y3_ref = _reference_forward(x, params3, stride=1, in_chs=in_chs, out_chs=out_chs)
    assert y3.shape == (2, out_chs, 16, 16), y3.shape
    assert jnp.allclose(y3.astype(jnp.float32), y3_ref, atol=5e-2, rtol=5e-2), "stride-1 mismatch"

    # 5) full identity branch (stride!=2, in_chs == out_chs).
    y4 = patch_embed_forward(x, params, stride=1, in_chs=in_chs, out_chs=in_chs)
    assert jnp.array_equal(y4, x), "identity branch mismatch"

    print("KERNEL_OK")
</pallas_src>

<mosaic_0001>
module attributes {stable_mosaic.version = 11 : i64} {
  func.func @_conv_bn_kernel(%arg0: i32, %arg1: i32, %arg2: memref<1x4x64xbf16, #tpu.memory_space<vmem>>, %arg3: memref<32x4xbf16, #tpu.memory_space<vmem>>, %arg4: memref<32x1xf32, #tpu.memory_space<vmem>>, %arg5: memref<1x32x64xbf16, #tpu.memory_space<vmem>>) attributes {dimension_semantics = [#tpu.dimension_semantics<parallel>, #tpu.dimension_semantics<parallel>], iteration_bounds = array<i64: 2, 1>, scalar_prefetch = 0 : i64, scratch_operands = 0 : i64, tpu.core_type = #tpu.core_type<tc>, window_params = [{transform_indices = @transform_0, window_bounds = array<i64: 1, 4, 64>}, {pipeline_mode = #tpu.pipeline_mode<synchronous>, transform_indices = @transform_1, window_bounds = array<i64: 32, 4>}, {pipeline_mode = #tpu.pipeline_mode<synchronous>, transform_indices = @transform_2, window_bounds = array<i64: 32, 1>}, {transform_indices = @transform_3, window_bounds = array<i64: 1, 32, 64>}]} {
    %c0 = arith.constant 0 : index
    %c0_0 = arith.constant 0 : index
    %0 = vector.load %arg3[%c0, %c0_0] : memref<32x4xbf16, #tpu.memory_space<vmem>>, vector<32x4xbf16>
    %c0_1 = arith.constant 0 : index
    %c0_2 = arith.constant 0 : index
    %c0_3 = arith.constant 0 : index
    %1 = vector.load %arg2[%c0_1, %c0_2, %c0_3] : memref<1x4x64xbf16, #tpu.memory_space<vmem>>, vector<1x4x64xbf16>
    %2 = vector.shape_cast %1 : vector<1x4x64xbf16> to vector<4x64xbf16>
    %cst = arith.constant dense<0.000000e+00> : vector<32x64xf32>
    %3 = tpu.matmul %0, %2, %cst {dimension_numbers = #tpu.dot_dimension_numbers<[1], [0], [0], [1], [0, 0, 1, 1], [], []>} : vector<32x4xbf16>, vector<4x64xbf16>, vector<32x64xf32> -> vector<32x64xf32>
    %c0_4 = arith.constant 0 : index
    %c0_5 = arith.constant 0 : index
    %4 = vector.load %arg4[%c0_4, %c0_5] : memref<32x1xf32, #tpu.memory_space<vmem>>, vector<32x1xf32>
    %5 = vector.broadcast %4 : vector<32x1xf32> to vector<32x64xf32>
    %6 = arith.addf %3, %5 : vector<32x64xf32>
    %7 = arith.truncf %6 : vector<32x64xf32> to vector<32x64xbf16>
    %c0_6 = arith.constant 0 : index
    %c0_7 = arith.constant 0 : index
    %c0_8 = arith.constant 0 : index
    %8 = vector.load %arg5[%c0_6, %c0_7, %c0_8] : memref<1x32x64xbf16, #tpu.memory_space<vmem>>, vector<1x32x64xbf16>
    %9 = vector.shape_cast %8 : vector<1x32x64xbf16> to vector<32x64xbf16>
    %10 = vector.shape_cast %7 : vector<32x64xbf16> to vector<1x32x64xbf16>
    tpu.vector_store %arg5[%c0_6, %c0_7, %c0_8], %10 {strides = array<i32>} : memref<1x32x64xbf16, #tpu.memory_space<vmem>>, vector<1x32x64xbf16>,
    return
  }
  func.func @transform_0(%arg0: i32, %arg1: i32) -> (i32, i32, i32) {
    %c0_i32 = arith.constant 0 : i32
    %c0_i32_0 = arith.constant 0 : i32
    return %arg0, %c0_i32, %arg1 : i32, i32, i32
  }
  func.func @transform_1(%arg0: i32, %arg1: i32) -> (i32, i32) {
    %c0_i32 = arith.constant 0 : i32
    %c0_i32_0 = arith.constant 0 : i32
    %c0_i32_1 = arith.constant 0 : i32
    return %c0_i32, %c0_i32_0 : i32, i32
  }
  func.func @transform_2(%arg0: i32, %arg1: i32) -> (i32, i32) {
    %c0_i32 = arith.constant 0 : i32
    %c0_i32_0 = arith.constant 0 : i32
    %c0_i32_1 = arith.constant 0 : i32
    return %c0_i32, %c0_i32_0 : i32, i32
  }
  func.func @transform_3(%arg0: i32, %arg1: i32) -> (i32, i32, i32) {
    %c0_i32 = arith.constant 0 : i32
    %c0_i32_0 = arith.constant 0 : i32
    return %arg0, %c0_i32, %arg1 : i32, i32, i32
  }
}

</mosaic_0001>

<bundles_post_ra>
// kernel: patch_embed_forward.1
= control target key start
LH: loop header
LB: loop body
LE: loop exit
PB: predicated region body
PF: predicated region fallthrough
CT: control target
= control target key end

     0   :  { %s507_s12 = smov 0   ;;  %s509_s13 = smov 0   ;;  %s564_s0 = inlined_call_operand.vmem [shape: bf16[2,4,64], index: 0, kind: input, shape index: {}]   ;;  %s565_s1 = inlined_call_operand.vmem [shape: bf16[32,4], index: 1, kind: input, shape index: {}]   ;;  %s566_s2 = inlined_call_operand.vmem [shape: f32[32,1], index: 2, kind: input, shape index: {}]   ;;  %s567_s3 = inlined_call_operand.vmem [shape: bf16[2,32,64], index: 3, kind: output, shape index: {}]  }
   0x1   :  { %s511_s14 = smov 0  }
   0x2 LB: > { %s25_s15 = sadd.s32 1, %s480_s13  ;;  %p404_p0 = scmp.ge.s32.totalorder %s484_s14, 1  ;;  %s484_s14 = sphi %s511_s14, %s13_s14   ;;  %s480_s13 = sphi %s509_s13, %s569_s13   ;;  %s476_s12 = sphi %s507_s12, %s568_s12  }
   0x3   : > { %p27_p1 = scmp.ge.s32.totalorder %s25_s15, 2  ;;  %p155_p2 = scmp.lt.s32.totalorder %s484_s14, 3 }
   0x5   : > { %s571_s15 = smov (%p27_p1, %s25_s15), 0  ;;  %p156_p3 = pnand %p404_p0, %p155_p2 }
   0x6   : > { %p184_p4 = scmp.lt.s32.totalorder (!%p156_p3), %s476_s12, 1  ;;  %v460_v0 = vld [vmem:[%s565_s1] sm:$0xff] (!%p156_p3)   ;;  %vm239_vm0 = vcmask (!%p156_p3), 31744   ;;  %v207_v1 = vld [vmem:[%s566_s2 + $0x10] sm:$0xff] (!%p156_p3)  ;;  %v486_v3 = vmov (!%p156_p3), 0   ;;  %vm246_vm1 = vcmask (!%p156_p3), 1041408  }
   0x7   : > { %159 = sbr.rel (%p156_p3) target bundleno = 242 (0xf2), region = 32  ;;  %v205_v2 = vld [vmem:[%s566_s2] sm:$0xff] (!%p156_p3)  ;;  %428 = vmatprep.mubr.msk.bf16.mxu0 (!%p156_p3), %vm239_vm0, %v460_v0  ;;  %459 = vset.pattern.permute.xlu1 (!%p156_p3), %v486_v3  ;;  %v208_v4 = vld [vmem:[%s566_s2 + $0x18] sm:$0xff] (!%p156_p3)  ;;  %v206_v6 = vld [vmem:[%s566_s2 + $0x8] sm:$0xff] (!%p156_p3)  ;;  %vm315_vm2 = vcmask (!%p156_p3), 519168  }
   0x8   : > { %458 = vset.pattern.permute.xlu0 (!%p156_p3), %v486_v3  ;;  %221 = vperm.xlu1 (!%p156_p3), %459, %v207_v1   ;;  %v461_v8 = vld [vmem:[%s565_s1 + $0x8] sm:$0xff] (!%p156_p3)  }
   0x9   : > { %211 = vperm.xlu0 (!%p156_p3), %458, %v205_v2  }
   0xc   : > { %226 = vperm.xlu1 (!%p156_p3), %459, %v208_v4  }
   0xd   : > { %216 = vperm.xlu0 (!%p156_p3), %458, %v206_v6  }
   0xe   : > { %s573_s12 = smov (!%p184_p4, %s476_s12), 1 }
   0xf   : > { %s405_s22 = sshll.u32 %s573_s12, 1  ;;  %s418_s5 = sshll.u32 %s573_s12, 4 }
  0x10   : > { %s190_s25 = scalar_lea.vmem %s564_s0, %s405_s22  ;;  %s198_s8 = scalar_lea.vmem %s567_s3, %s418_s5 }
  0x11   : > { %v204_v5 = vld [vmem:[%s190_s25] sm:$0x3] }
  0x12   : > { %432 = vmatprep.subr.msk.bf16.mxu0 %vm246_vm1, %v204_v5  ;;  %v248_v7 = vsel %vm246_vm1, %v204_v5, 0 }
  0x13   : > { %427 = vmatpush3.bf16.msra.mxu0 %v248_v7 }
  0x16   : > { %429 = vmatmul.mubr.msk.bf16.vlgmr.msra.gmra.mrb[0].mxu0 %vm239_vm0, %v461_v8 }
  0x87   : > { %v222_v9 = vpop.permute.xlu1 %221 }
  0x88   : > { %v212_v10 = vpop.permute.xlu0 %211 }
  0x8b   : > { %v227_v14 = vpop.permute.xlu1 %226 }
  0x8c   : > { %v217_v17 = vpop.permute.xlu0 %216 }
  0xe9   : > { %v430_v11 = vpop.f32.mrb[0].mxu0 }
  0xea   : > { %v293_v12 = vadd.f32 %v430_v11, %v222_v9  ;;  %v284_v13 = vpop.f32.mrb[1].mxu0 }
  0xeb   : > { %v285_v15 = vadd.f32 %v284_v13, %v212_v10  ;;  %v431_v16 = vpop.f32.mrb[2].mxu0 }
  0xec   : > { %v421_v18 = vpack.c.bf16 %v293_v12, %v293_v12  ;;  %v296_v19 = vadd.f32 %v431_v16, %v227_v14  ;;  %v287_v20 = vpop.f32.mrb[3].mxu0 }
  0xed   : > { %v419_v21 = vpack.c.bf16 %v285_v15, %v285_v15  ;;  %v288_v22 = vadd.f32 %v287_v20, %v217_v17 }
  0xee   : > { %318 = vst.msk [vmem:[%s198_s8 + $0x8] sm:$0xf] %vm315_vm2, %v421_v18  ;;  %v422_v23 = vpack.c.bf16 %v296_v19, %v296_v19 }
  0xef   : > { %316 = vst.msk [vmem:[%s198_s8] sm:$0xf] %vm315_vm2, %v419_v21  ;;  %v420_v24 = vpack.c.bf16 %v288_v22, %v288_v22 }
  0xf0   : > { %319 = vst.msk [vmem:[%s198_s8 + $0xc] sm:$0xf] %vm315_vm2, %v422_v23 }
  0xf1   : > { %317 = vst.msk [vmem:[%s198_s8 + $0x4] sm:$0xf] %vm315_vm2, %v420_v24 }
  0xf2 PF: > { %s13_s14 = sadd.s32 1, %s484_s14   ;;  %s568_s12 = smov %s480_s13 }
  0xf3   : > { %p10_p5 = scmp.ge.s32.totalorder %s13_s14, 4   ;;  %s569_s13 = smov %s571_s15 }
  0xf5   :  { %12 = sbr.rel (!%p10_p5) target bundleno = 2 (0x2), region = 62 }

</bundles_post_ra>
